<compile_context>
chip_gen: v5e
topology: v5e:2x2
jax: 0.10.0
libtpu: 0.0.40
codegen_flags: <defaults>
</compile_context>

<pallas_src>
import functools

import jax
import jax.numpy as jnp
import numpy as np
from jax.experimental import pallas as pl
from jax.experimental.pallas import tpu as pltpu


def _layernorm(v, w_row, b_row, eps=1e-7):
    # v: (R, E) fp32; w_row/b_row: (E,) fp32.  eps matches the module (1e-07).
    mu = jnp.mean(v, axis=-1, keepdims=True)
    var = jnp.mean((v - mu) ** 2, axis=-1, keepdims=True)
    return (v - mu) * jax.lax.rsqrt(var + eps) * w_row + b_row


def _block_kernel(x_ref, ln1_w_ref, ln1_b_ref, wqkv_ref, bqkv_ref,
                  wo_ref, bo_ref, ln2_w_ref, ln2_b_ref,
                  wfc_ref, bfc_ref, wproj_ref, bproj_ref,
                  o_ref,
                  *, seq_len, d_model, n_head, block_batch, compute_dtype,
                  mlp_chunks):
    E = d_model
    H = n_head
    Dh = E // H
    Nb = block_batch
    Lp = x_ref.shape[1]            # padded sequence length (multiple of 8)
    R = Nb * Lp                    # flattened rows processed this grid step
    F = wfc_ref.shape[1]           # 4 * E
    scale = 1.0 / (Dh ** 0.5)
    cd = compute_dtype
    exact = np.dtype(cd) == np.dtype(jnp.float32)

    x = x_ref[...].astype(jnp.float32).reshape(R, E)

    # ---------------- ln_1 + fused QKV projection ----------------
    h = _layernorm(x, ln1_w_ref[0].astype(jnp.float32),
                   ln1_b_ref[0].astype(jnp.float32))
    # Single MXU call producing all of Q, K, V: (R, E) @ (E, 3E), f32 accum.
    qkv = jnp.dot(h.astype(cd), wqkv_ref[...],
                  preferred_element_type=jnp.float32)
    # Bias in f32, then keep ONE compute-dtype (R, 3E) slab for all of attention.
    qkv = (qkv + bqkv_ref[0].astype(jnp.float32)).astype(cd)

    # Leading-dim split only (no relayout): (R, E) -> (Nb, Lp, E) per Q/K/V.
    q_all = qkv[:, :E].reshape(Nb, Lp, E)
    k_all = qkv[:, E:2 * E].reshape(Nb, Lp, E)
    v_all = qkv[:, 2 * E:].reshape(Nb, Lp, E)

    # Pad-key mask built once per grid step (hoisted out of the head loop).
    if Lp != seq_len:
        key_valid = jax.lax.broadcasted_iota(jnp.int32, (1, 1, Lp), 2) < seq_len
    else:
        key_valid = None

    # ---------------- multi-head self-attention ----------------
    # Loop over heads only; each einsum is batched over the Nb batch rows.
    head_outs = []
    for hh in range(H):
        lo = hh * Dh
        qh = q_all[..., lo:lo + Dh] * scale                      # (Nb, Lp, Dh)
        kh = k_all[..., lo:lo + Dh]
        vh = v_all[..., lo:lo + Dh]
        s = jnp.einsum("bqd,bkd->bqk", qh, kh,
                       preferred_element_type=jnp.float32)       # (Nb, Lp, Lp)
        if key_valid is not None:
            s = jnp.where(key_valid, s, -1e30)                   # mask pad keys
        s = s - jnp.max(s, axis=-1, keepdims=True)
        p = jnp.exp(s)
        denom = jnp.sum(p, axis=-1, keepdims=True)
        if exact:
            p = p / denom
        else:
            p = p * pl.reciprocal(denom, approx=True)
        oh = jnp.einsum("bqk,bkd->bqd", p.astype(cd), vh,
                        preferred_element_type=jnp.float32)      # (Nb, Lp, Dh)
        head_outs.append(oh.astype(cd))

    # Merge heads and do ONE K=E output projection (no per-head Wo slices).
    o_cat = jnp.concatenate(head_outs, axis=-1).reshape(R, E)    # (R, E) cd
    attn = jnp.dot(o_cat, wo_ref[...], preferred_element_type=jnp.float32)
    attn = attn + bo_ref[0].astype(jnp.float32)

    x1 = x + attn                                                # residual 1

    # ---------------- ln_2 + MLP (c_fc -> QuickGELU -> c_proj) ----------------
    h2 = _layernorm(x1, ln2_w_ref[0].astype(jnp.float32),
                    ln2_b_ref[0].astype(jnp.float32)).astype(cd)
    csz = F // mlp_chunks
    mlp = None
    for c in range(mlp_chunks):                  # chunk the 4E hidden dim
        c0 = c * csz
        fc = jnp.dot(h2, wfc_ref[:, c0:c0 + csz],
                     preferred_element_type=jnp.float32)
        fc = fc + bfc_ref[0, c0:c0 + csz].astype(jnp.float32)    # (R, csz) f32
        g = fc * jax.nn.sigmoid(1.702 * fc)                      # QuickGELU
        part = jnp.dot(g.astype(cd), wproj_ref[c0:c0 + csz, :],
                       preferred_element_type=jnp.float32)       # (R, E)
        mlp = part if mlp is None else mlp + part
    mlp = mlp + bproj_ref[0].astype(jnp.float32)

    o_ref[...] = (x1 + mlp).reshape(Nb, Lp, E).astype(o_ref.dtype)


def prepare_params(params, compute_dtype=jnp.bfloat16):
    """One-time parameter prep: transpose weights and cast to the matmul input
    dtype so no per-call HBM round trip is spent on it.  Biases / LayerNorm
    parameters stay f32."""
    cd = compute_dtype
    f32 = jnp.float32
    return {
        "compute_dtype": cd,
        "ln1_w": params["ln1_w"].astype(f32), "ln1_b": params["ln1_b"].astype(f32),
        "wqkv": jnp.transpose(params["in_w"]).astype(cd),     # (E, 3E)
        "bqkv": params["in_b"].astype(f32),
        "wo": jnp.transpose(params["out_w"]).astype(cd),      # (E, E)
        "bo": params["out_b"].astype(f32),
        "ln2_w": params["ln2_w"].astype(f32), "ln2_b": params["ln2_b"].astype(f32),
        "wfc": jnp.transpose(params["fc_w"]).astype(cd),      # (E, 4E)
        "bfc": params["fc_b"].astype(f32),
        "wproj": jnp.transpose(params["proj_w"]).astype(cd),  # (4E, E)
        "bproj": params["proj_b"].astype(f32),
    }


def _vmem_plan():
    """Chip-aware VMEM limit + rows-per-step target (v7x has half the VMEM)."""
    try:
        cap = int(pltpu.get_tpu_info().vmem_capacity_bytes)
    except Exception:
        cap = 128 * 1024 * 1024
    vmem_limit = max(32 * 1024 * 1024,
                     min(cap - 16 * 1024 * 1024, 110 * 1024 * 1024))
    target_rows = 512 if cap <= 64 * 1024 * 1024 else 1024
    return vmem_limit, target_rows


def residual_attention_block(x_lne, prepared, *, d_model, n_head,
                             block_batch=None, mlp_chunks=None):
    """x_lne: (L, N, E), same layout as the PyTorch module. Returns (L, N, E).
    `prepared` comes from prepare_params()."""
    L, N, E = x_lne.shape
    assert E == d_model and E % n_head == 0
    cd = prepared["compute_dtype"]

    vmem_limit, target_rows = _vmem_plan()

    # Pad seq length to a sublane-dense multiple of 8; pad keys are masked out
    # of the softmax inside the kernel and pad rows are sliced off at the end.
    Lp = ((L + 7) // 8) * 8
    x_nle = jnp.transpose(x_lne, (1, 0, 2))                      # (N, L, E)
    if Lp != L:
        x_nle = jnp.pad(x_nle, ((0, 0), (0, Lp - L), (0, 0)))

    # Rows-per-grid-step: several batch elements per step so dense matmuls have
    # a big M and per-step overhead is amortized; keep >= 2 grid steps when the
    # batch allows so megacore "parallel" sharding has work on both TCs.
    if block_batch is None:
        block_batch = max(1, min(N, target_rows // Lp))
        while N % block_batch:
            block_batch -= 1
        while block_batch > 1 and N // block_batch < 2:
            block_batch -= 1
            while N % block_batch:
                block_batch -= 1
    Nb = block_batch
    assert N % Nb == 0

    # MLP hidden-dim chunking: cap the f32 fc/gelu intermediate width.
    F = 4 * E
    if mlp_chunks is None:
        mlp_chunks = 1
        while F % (mlp_chunks * 2) == 0 and F // mlp_chunks > 2048:
            mlp_chunks *= 2
    assert F % mlp_chunks == 0

    kernel = functools.partial(_block_kernel, seq_len=L, d_model=E,
                               n_head=n_head, block_batch=Nb, compute_dtype=cd,
                               mlp_chunks=mlp_chunks)

    full = lambda shape: pl.BlockSpec(shape, lambda i: (0,) * len(shape))
    in_specs = [
        pl.BlockSpec((Nb, Lp, E), lambda i: (i, 0, 0)),          # x
        full((1, E)), full((1, E)),                              # ln_1 w, b
        full((E, 3 * E)), full((1, 3 * E)),                      # in_proj w^T, b
        full((E, E)), full((1, E)),                              # out_proj w^T, b
        full((1, E)), full((1, E)),                              # ln_2 w, b
        full((E, 4 * E)), full((1, 4 * E)),                      # c_fc w^T, b
        full((4 * E, E)), full((1, E)),                          # c_proj w^T, b
    ]

    out = pl.pallas_call(
        kernel,
        out_shape=jax.ShapeDtypeStruct((N, Lp, E), x_lne.dtype),
        grid_spec=pltpu.PrefetchScalarGridSpec(
            num_scalar_prefetch=0,
            grid=(N // Nb,),
            in_specs=in_specs,
            out_specs=pl.BlockSpec((Nb, Lp, E), lambda i: (i, 0, 0)),
        ),
        compiler_params=pltpu.CompilerParams(
            dimension_semantics=("parallel",),        # megacore-shard the batch
            vmem_limit_bytes=vmem_limit),
    )(x_nle,
      prepared["ln1_w"], prepared["ln1_b"],
      prepared["wqkv"], prepared["bqkv"],
      prepared["wo"], prepared["bo"],
      prepared["ln2_w"], prepared["ln2_b"],
      prepared["wfc"], prepared["bfc"],
      prepared["wproj"], prepared["bproj"])

    out = out[:, :L, :]                                          # drop seq pad
    return jnp.transpose(out, (1, 0, 2))                         # back to (L,N,E)


# ---------------------- pure-JAX reference (for validation) ----------------------
def _reference(x_lne, params, *, d_model, n_head):
    def ln(v, w, b):
        mu = jnp.mean(v, axis=-1, keepdims=True)
        var = jnp.mean((v - mu) ** 2, axis=-1, keepdims=True)
        return (v - mu) * jax.lax.rsqrt(var + 1e-7) * w + b

    L, N, E = x_lne.shape
    dh = E // n_head
    x = x_lne.astype(jnp.float32)

    h = ln(x, params["ln1_w"][0], params["ln1_b"][0])
    qkv = jnp.einsum("lne,fe->lnf", h, params["in_w"]) + params["in_b"][0]
    q, k, v = qkv[..., :E], qkv[..., E:2 * E], qkv[..., 2 * E:]
    q = q.reshape(L, N, n_head, dh) / (dh ** 0.5)
    k = k.reshape(L, N, n_head, dh)
    v = v.reshape(L, N, n_head, dh)
    s = jnp.einsum("qnhd,knhd->nhqk", q, k)
    p = jax.nn.softmax(s, axis=-1)
    a = jnp.einsum("nhqk,knhd->qnhd", p, v).reshape(L, N, E)
    a = jnp.einsum("lne,fe->lnf", a, params["out_w"]) + params["out_b"][0]
    x = x + a

    h2 = ln(x, params["ln2_w"][0], params["ln2_b"][0])
    fc = jnp.einsum("lne,fe->lnf", h2, params["fc_w"]) + params["fc_b"][0]
    g = fc * jax.nn.sigmoid(1.702 * fc)
    mlp = jnp.einsum("lnf,ef->lne", g, params["proj_w"]) + params["proj_b"][0]
    return x + mlp


if __name__ == "__main__":
    L, N, E, H = 8, 2, 32, 4          # seq, batch, d_model, n_head
    key = jax.random.PRNGKey(0)
    keys = jax.random.split(key, 16)

    def rnd(k, shape, scale=0.05):
        return (scale * jax.random.normal(k, shape)).astype(jnp.float32)

    params = {
        "ln1_w": jnp.ones((1, E), jnp.float32) + rnd(keys[0], (1, E)),
        "ln1_b": rnd(keys[1], (1, E)),
        "in_w": rnd(keys[2], (3 * E, E)),
        "in_b": rnd(keys[3], (1, 3 * E)),
        "out_w": rnd(keys[4], (E, E)),
        "out_b": rnd(keys[5], (1, E)),
        "ln2_w": jnp.ones((1, E), jnp.float32) + rnd(keys[6], (1, E)),
        "ln2_b": rnd(keys[7], (1, E)),
        "fc_w": rnd(keys[8], (4 * E, E)),
        "fc_b": rnd(keys[9], (1, 4 * E)),
        "proj_w": rnd(keys[10], (E, 4 * E)),
        "proj_b": rnd(keys[11], (1, E)),
    }

    x = jax.random.normal(keys[12], (L, N, E), dtype=jnp.float32)
    ref = jax.block_until_ready(_reference(x, params, d_model=E, n_head=H))

    # f32 compute path (tight check of kernel math; exact reciprocal).
    prep_f32 = prepare_params(params, compute_dtype=jnp.float32)
    out_f32 = jax.block_until_ready(
        residual_attention_block(x, prep_f32, d_model=E, n_head=H))
    np.testing.assert_allclose(np.asarray(out_f32), np.asarray(ref),
                               rtol=5e-3, atol=5e-3)

    # Default bf16-matmul / f32-accumulate path (MXU-native).
    prep_bf16 = prepare_params(params, compute_dtype=jnp.bfloat16)
    out_bf16 = jax.block_until_ready(
        residual_attention_block(x, prep_bf16, d_model=E, n_head=H))
    np.testing.assert_allclose(np.asarray(out_bf16), np.asarray(ref),
                               rtol=3e-2, atol=3e-2)

    # Non-multiple-of-8 sequence length exercises the pad + softmax-mask path.
    L2 = 6
    x2 = jax.random.normal(keys[13], (L2, N, E), dtype=jnp.float32)
    ref2 = jax.block_until_ready(_reference(x2, params, d_model=E, n_head=H))
    out2 = jax.block_until_ready(
        residual_attention_block(x2, prep_bf16, d_model=E, n_head=H))
    np.testing.assert_allclose(np.asarray(out2), np.asarray(ref2),
                               rtol=3e-2, atol=3e-2)

    print("KERNEL_OK")
</pallas_src>

<mosaic_0001>
module attributes {stable_mosaic.version = 11 : i64} {
  func.func @_block_kernel(%arg0: i32, %arg1: memref<1x8x32xf32, #tpu.memory_space<vmem>>, %arg2: memref<1x32xf32, #tpu.memory_space<vmem>>, %arg3: memref<1x32xf32, #tpu.memory_space<vmem>>, %arg4: memref<32x96xf32, #tpu.memory_space<vmem>>, %arg5: memref<1x96xf32, #tpu.memory_space<vmem>>, %arg6: memref<32x32xf32, #tpu.memory_space<vmem>>, %arg7: memref<1x32xf32, #tpu.memory_space<vmem>>, %arg8: memref<1x32xf32, #tpu.memory_space<vmem>>, %arg9: memref<1x32xf32, #tpu.memory_space<vmem>>, %arg10: memref<32x128xf32, #tpu.memory_space<vmem>>, %arg11: memref<1x128xf32, #tpu.memory_space<vmem>>, %arg12: memref<128x32xf32, #tpu.memory_space<vmem>>, %arg13: memref<1x32xf32, #tpu.memory_space<vmem>>, %arg14: memref<1x8x32xf32, #tpu.memory_space<vmem>>) attributes {dimension_semantics = [#tpu.dimension_semantics<parallel>], iteration_bounds = array<i64: 2>, scalar_prefetch = 0 : i64, scratch_operands = 0 : i64, tpu.core_type = #tpu.core_type<tc>, window_params = [{transform_indices = @transform_0, window_bounds = array<i64: 1, 8, 32>}, {pipeline_mode = #tpu.pipeline_mode<synchronous>, transform_indices = @transform_1, window_bounds = array<i64: 1, 32>}, {pipeline_mode = #tpu.pipeline_mode<synchronous>, transform_indices = @transform_2, window_bounds = array<i64: 1, 32>}, {pipeline_mode = #tpu.pipeline_mode<synchronous>, transform_indices = @transform_3, window_bounds = array<i64: 32, 96>}, {pipeline_mode = #tpu.pipeline_mode<synchronous>, transform_indices = @transform_4, window_bounds = array<i64: 1, 96>}, {pipeline_mode = #tpu.pipeline_mode<synchronous>, transform_indices = @transform_5, window_bounds = array<i64: 32, 32>}, {pipeline_mode = #tpu.pipeline_mode<synchronous>, transform_indices = @transform_6, window_bounds = array<i64: 1, 32>}, {pipeline_mode = #tpu.pipeline_mode<synchronous>, transform_indices = @transform_7, window_bounds = array<i64: 1, 32>}, {pipeline_mode = #tpu.pipeline_mode<synchronous>, transform_indices = @transform_8, window_bounds = array<i64: 1, 32>}, {pipeline_mode = #tpu.pipeline_mode<synchronous>, transform_indices = @transform_9, window_bounds = array<i64: 32, 128>}, {pipeline_mode = #tpu.pipeline_mode<synchronous>, transform_indices = @transform_10, window_bounds = array<i64: 1, 128>}, {pipeline_mode = #tpu.pipeline_mode<synchronous>, transform_indices = @transform_11, window_bounds = array<i64: 128, 32>}, {pipeline_mode = #tpu.pipeline_mode<synchronous>, transform_indices = @transform_12, window_bounds = array<i64: 1, 32>}, {transform_indices = @transform_13, window_bounds = array<i64: 1, 8, 32>}]} {
    %c0 = arith.constant 0 : index
    %c0_0 = arith.constant 0 : index
    %c0_1 = arith.constant 0 : index
    %0 = vector.load %arg1[%c0, %c0_0, %c0_1] : memref<1x8x32xf32, #tpu.memory_space<vmem>>, vector<1x8x32xf32>
    %1 = vector.shape_cast %0 : vector<1x8x32xf32> to vector<8x32xf32>
    %c0_2 = arith.constant 0 : index
    %c0_3 = arith.constant 0 : index
    %2 = vector.load %arg2[%c0_2, %c0_3] : memref<1x32xf32, #tpu.memory_space<vmem>>, vector<1x32xf32>
    %3 = vector.shape_cast %2 : vector<1x32xf32> to vector<32xf32>
    %c0_4 = arith.constant 0 : index
    %c0_5 = arith.constant 0 : index
    %4 = vector.load %arg3[%c0_4, %c0_5] : memref<1x32xf32, #tpu.memory_space<vmem>>, vector<1x32xf32>
    %5 = vector.shape_cast %4 : vector<1x32xf32> to vector<32xf32>
    %cst = arith.constant dense<0.000000e+00> : vector<8xf32>
    %6 = vector.multi_reduction <add>, %1, %cst [1] : vector<8x32xf32> to vector<8xf32>
    %7 = vector.shape_cast %6 : vector<8xf32> to vector<8x1xf32>
    %cst_6 = arith.constant 3.200000e+01 : f32
    %8 = vector.broadcast %cst_6 : f32 to vector<8x1xf32>
    %9 = arith.divf %7, %8 : vector<8x1xf32>
    %10 = vector.broadcast %9 : vector<8x1xf32> to vector<8x32xf32>
    %11 = arith.subf %1, %10 : vector<8x32xf32>
    %12 = arith.mulf %11, %11 : vector<8x32xf32>
    %cst_7 = arith.constant dense<0.000000e+00> : vector<8xf32>
    %13 = vector.multi_reduction <add>, %12, %cst_7 [1] : vector<8x32xf32> to vector<8xf32>
    %14 = vector.shape_cast %13 : vector<8xf32> to vector<8x1xf32>
    %cst_8 = arith.constant 3.200000e+01 : f32
    %15 = vector.broadcast %cst_8 : f32 to vector<8x1xf32>
    %16 = arith.divf %14, %15 : vector<8x1xf32>
    %17 = vector.broadcast %9 : vector<8x1xf32> to vector<8x32xf32>
    %18 = arith.subf %1, %17 : vector<8x32xf32>
    %cst_9 = arith.constant 1.000000e-07 : f32
    %19 = vector.broadcast %cst_9 : f32 to vector<8x1xf32>
    %20 = arith.addf %16, %19 : vector<8x1xf32>
    %21 = math.rsqrt %20 : vector<8x1xf32>
    %22 = vector.broadcast %21 : vector<8x1xf32> to vector<8x32xf32>
    %23 = arith.mulf %18, %22 : vector<8x32xf32>
    %24 = vector.shape_cast %3 : vector<32xf32> to vector<1x32xf32>
    %25 = vector.broadcast %24 : vector<1x32xf32> to vector<8x32xf32>
    %26 = arith.mulf %23, %25 : vector<8x32xf32>
    %27 = vector.shape_cast %5 : vector<32xf32> to vector<1x32xf32>
    %28 = vector.broadcast %27 : vector<1x32xf32> to vector<8x32xf32>
    %29 = arith.addf %26, %28 : vector<8x32xf32>
    %c0_10 = arith.constant 0 : index
    %c0_11 = arith.constant 0 : index
    %30 = vector.load %arg4[%c0_10, %c0_11] : memref<32x96xf32, #tpu.memory_space<vmem>>, vector<32x96xf32>
    %cst_12 = arith.constant dense<0.000000e+00> : vector<8x96xf32>
    %31 = tpu.matmul %29, %30, %cst_12 {dimension_numbers = #tpu.dot_dimension_numbers<[1], [0], [0], [1], [0, 0, 1, 1], [], []>} : vector<8x32xf32>, vector<32x96xf32>, vector<8x96xf32> -> vector<8x96xf32>
    %c0_13 = arith.constant 0 : index
    %c0_14 = arith.constant 0 : index
    %32 = vector.load %arg5[%c0_13, %c0_14] : memref<1x96xf32, #tpu.memory_space<vmem>>, vector<1x96xf32>
    %33 = vector.shape_cast %32 : vector<1x96xf32> to vector<96xf32>
    %34 = vector.shape_cast %33 : vector<96xf32> to vector<1x96xf32>
    %35 = vector.broadcast %34 : vector<1x96xf32> to vector<8x96xf32>
    %36 = arith.addf %31, %35 : vector<8x96xf32>
    %37 = vector.extract_strided_slice %36 {offsets = [0, 0], sizes = [8, 32], strides = [1, 1]} : vector<8x96xf32> to vector<8x32xf32>
    %38 = vector.shape_cast %37 : vector<8x32xf32> to vector<1x8x32xf32>
    %39 = vector.extract_strided_slice %36 {offsets = [0, 32], sizes = [8, 32], strides = [1, 1]} : vector<8x96xf32> to vector<8x32xf32>
    %40 = vector.shape_cast %39 : vector<8x32xf32> to vector<1x8x32xf32>
    %41 = vector.extract_strided_slice %36 {offsets = [0, 64], sizes = [8, 32], strides = [1, 1]} : vector<8x96xf32> to vector<8x32xf32>
    %42 = vector.shape_cast %41 : vector<8x32xf32> to vector<1x8x32xf32>
    %43 = vector.extract_strided_slice %38 {offsets = [0, 0, 0], sizes = [1, 8, 8], strides = [1, 1, 1]} : vector<1x8x32xf32> to vector<1x8x8xf32>
    %cst_15 = arith.constant 0.353553385 : f32
    %44 = vector.broadcast %cst_15 : f32 to vector<1x8x8xf32>
    %45 = arith.mulf %43, %44 : vector<1x8x8xf32>
    %46 = vector.extract_strided_slice %40 {offsets = [0, 0, 0], sizes = [1, 8, 8], strides = [1, 1, 1]} : vector<1x8x32xf32> to vector<1x8x8xf32>
    %47 = vector.extract_strided_slice %42 {offsets = [0, 0, 0], sizes = [1, 8, 8], strides = [1, 1, 1]} : vector<1x8x32xf32> to vector<1x8x8xf32>
    "tpu.trace_start"() <{level = 10 : i32, message = "bqd,bkd->bqk"}> : () -> ()
    %cst_16 = arith.constant dense<0.000000e+00> : vector<1x8x8xf32>
    %48 = tpu.matmul %45, %46, %cst_16 {dimension_numbers = #tpu.dot_dimension_numbers<[2], [2], [1], [1], [0, 0, 0, 1, 1, 1], [0], [0]>} : vector<1x8x8xf32>, vector<1x8x8xf32>, vector<1x8x8xf32> -> vector<1x8x8xf32>
    "tpu.trace_stop"() : () -> ()
    %cst_17 = arith.constant dense<0xFF800000> : vector<1x8xf32>
    %49 = vector.multi_reduction <maximumf>, %48, %cst_17 [2] : vector<1x8x8xf32> to vector<1x8xf32>
    %50 = vector.shape_cast %49 : vector<1x8xf32> to vector<1x8x1xf32>
    %51 = vector.broadcast %50 : vector<1x8x1xf32> to vector<1x8x8xf32>
    %52 = arith.subf %48, %51 : vector<1x8x8xf32>
    %53 = math.exp %52 : vector<1x8x8xf32>
    %cst_18 = arith.constant dense<0.000000e+00> : vector<1x8xf32>
    %54 = vector.multi_reduction <add>, %53, %cst_18 [2] : vector<1x8x8xf32> to vector<1x8xf32>
    %55 = vector.shape_cast %54 : vector<1x8xf32> to vector<1x8x1xf32>
    %56 = vector.broadcast %55 : vector<1x8x1xf32> to vector<1x8x8xf32>
    %57 = arith.divf %53, %56 : vector<1x8x8xf32>
    "tpu.trace_start"() <{level = 10 : i32, message = "bqk,bkd->bqd"}> : () -> ()
    %cst_19 = arith.constant dense<0.000000e+00> : vector<1x8x8xf32>
    %58 = tpu.matmul %57, %47, %cst_19 {dimension_numbers = #tpu.dot_dimension_numbers<[2], [1], [1], [2], [0, 0, 0, 1, 1, 2], [0], [0]>} : vector<1x8x8xf32>, vector<1x8x8xf32>, vector<1x8x8xf32> -> vector<1x8x8xf32>
    "tpu.trace_stop"() : () -> ()
    %59 = vector.extract_strided_slice %38 {offsets = [0, 0, 8], sizes = [1, 8, 8], strides = [1, 1, 1]} : vector<1x8x32xf32> to vector<1x8x8xf32>
    %cst_20 = arith.constant 0.353553385 : f32
    %60 = vector.broadcast %cst_20 : f32 to vector<1x8x8xf32>
    %61 = arith.mulf %59, %60 : vector<1x8x8xf32>
    %62 = vector.extract_strided_slice %40 {offsets = [0, 0, 8], sizes = [1, 8, 8], strides = [1, 1, 1]} : vector<1x8x32xf32> to vector<1x8x8xf32>
    %63 = vector.extract_strided_slice %42 {offsets = [0, 0, 8], sizes = [1, 8, 8], strides = [1, 1, 1]} : vector<1x8x32xf32> to vector<1x8x8xf32>
    "tpu.trace_start"() <{level = 10 : i32, message = "bqd,bkd->bqk"}> : () -> ()
    %cst_21 = arith.constant dense<0.000000e+00> : vector<1x8x8xf32>
    %64 = tpu.matmul %61, %62, %cst_21 {dimension_numbers = #tpu.dot_dimension_numbers<[2], [2], [1], [1], [0, 0, 0, 1, 1, 1], [0], [0]>} : vector<1x8x8xf32>, vector<1x8x8xf32>, vector<1x8x8xf32> -> vector<1x8x8xf32>
    "tpu.trace_stop"() : () -> ()
    %cst_22 = arith.constant dense<0xFF800000> : vector<1x8xf32>
    %65 = vector.multi_reduction <maximumf>, %64, %cst_22 [2] : vector<1x8x8xf32> to vector<1x8xf32>
    %66 = vector.shape_cast %65 : vector<1x8xf32> to vector<1x8x1xf32>
    %67 = vector.broadcast %66 : vector<1x8x1xf32> to vector<1x8x8xf32>
    %68 = arith.subf %64, %67 : vector<1x8x8xf32>
    %69 = math.exp %68 : vector<1x8x8xf32>
    %cst_23 = arith.constant dense<0.000000e+00> : vector<1x8xf32>
    %70 = vector.multi_reduction <add>, %69, %cst_23 [2] : vector<1x8x8xf32> to vector<1x8xf32>
    %71 = vector.shape_cast %70 : vector<1x8xf32> to vector<1x8x1xf32>
    %72 = vector.broadcast %71 : vector<1x8x1xf32> to vector<1x8x8xf32>
    %73 = arith.divf %69, %72 : vector<1x8x8xf32>
    "tpu.trace_start"() <{level = 10 : i32, message = "bqk,bkd->bqd"}> : () -> ()
    %cst_24 = arith.constant dense<0.000000e+00> : vector<1x8x8xf32>
    %74 = tpu.matmul %73, %63, %cst_24 {dimension_numbers = #tpu.dot_dimension_numbers<[2], [1], [1], [2], [0, 0, 0, 1, 1, 2], [0], [0]>} : vector<1x8x8xf32>, vector<1x8x8xf32>, vector<1x8x8xf32> -> vector<1x8x8xf32>
    "tpu.trace_stop"() : () -> ()
    %75 = vector.extract_strided_slice %38 {offsets = [0, 0, 16], sizes = [1, 8, 8], strides = [1, 1, 1]} : vector<1x8x32xf32> to vector<1x8x8xf32>
    %cst_25 = arith.constant 0.353553385 : f32
    %76 = vector.broadcast %cst_25 : f32 to vector<1x8x8xf32>
    %77 = arith.mulf %75, %76 : vector<1x8x8xf32>
    %78 = vector.extract_strided_slice %40 {offsets = [0, 0, 16], sizes = [1, 8, 8], strides = [1, 1, 1]} : vector<1x8x32xf32> to vector<1x8x8xf32>
    %79 = vector.extract_strided_slice %42 {offsets = [0, 0, 16], sizes = [1, 8, 8], strides = [1, 1, 1]} : vector<1x8x32xf32> to vector<1x8x8xf32>
    "tpu.trace_start"() <{level = 10 : i32, message = "bqd,bkd->bqk"}> : () -> ()
    %cst_26 = arith.constant dense<0.000000e+00> : vector<1x8x8xf32>
    %80 = tpu.matmul %77, %78, %cst_26 {dimension_numbers = #tpu.dot_dimension_numbers<[2], [2], [1], [1], [0, 0, 0, 1, 1, 1], [0], [0]>} : vector<1x8x8xf32>, vector<1x8x8xf32>, vector<1x8x8xf32> -> vector<1x8x8xf32>
    "tpu.trace_stop"() : () -> ()
    %cst_27 = arith.constant dense<0xFF800000> : vector<1x8xf32>
    %81 = vector.multi_reduction <maximumf>, %80, %cst_27 [2] : vector<1x8x8xf32> to vector<1x8xf32>
    %82 = vector.shape_cast %81 : vector<1x8xf32> to vector<1x8x1xf32>
    %83 = vector.broadcast %82 : vector<1x8x1xf32> to vector<1x8x8xf32>
    %84 = arith.subf %80, %83 : vector<1x8x8xf32>
    %85 = math.exp %84 : vector<1x8x8xf32>
    %cst_28 = arith.constant dense<0.000000e+00> : vector<1x8xf32>
    %86 = vector.multi_reduction <add>, %85, %cst_28 [2] : vector<1x8x8xf32> to vector<1x8xf32>
    %87 = vector.shape_cast %86 : vector<1x8xf32> to vector<1x8x1xf32>
    %88 = vector.broadcast %87 : vector<1x8x1xf32> to vector<1x8x8xf32>
    %89 = arith.divf %85, %88 : vector<1x8x8xf32>
    "tpu.trace_start"() <{level = 10 : i32, message = "bqk,bkd->bqd"}> : () -> ()
    %cst_29 = arith.constant dense<0.000000e+00> : vector<1x8x8xf32>
    %90 = tpu.matmul %89, %79, %cst_29 {dimension_numbers = #tpu.dot_dimension_numbers<[2], [1], [1], [2], [0, 0, 0, 1, 1, 2], [0], [0]>} : vector<1x8x8xf32>, vector<1x8x8xf32>, vector<1x8x8xf32> -> vector<1x8x8xf32>
    "tpu.trace_stop"() : () -> ()
    %91 = vector.extract_strided_slice %38 {offsets = [0, 0, 24], sizes = [1, 8, 8], strides = [1, 1, 1]} : vector<1x8x32xf32> to vector<1x8x8xf32>
    %cst_30 = arith.constant 0.353553385 : f32
    %92 = vector.broadcast %cst_30 : f32 to vector<1x8x8xf32>
    %93 = arith.mulf %91, %92 : vector<1x8x8xf32>
    %94 = vector.extract_strided_slice %40 {offsets = [0, 0, 24], sizes = [1, 8, 8], strides = [1, 1, 1]} : vector<1x8x32xf32> to vector<1x8x8xf32>
    %95 = vector.extract_strided_slice %42 {offsets = [0, 0, 24], sizes = [1, 8, 8], strides = [1, 1, 1]} : vector<1x8x32xf32> to vector<1x8x8xf32>
    "tpu.trace_start"() <{level = 10 : i32, message = "bqd,bkd->bqk"}> : () -> ()
    %cst_31 = arith.constant dense<0.000000e+00> : vector<1x8x8xf32>
    %96 = tpu.matmul %93, %94, %cst_31 {dimension_numbers = #tpu.dot_dimension_numbers<[2], [2], [1], [1], [0, 0, 0, 1, 1, 1], [0], [0]>} : vector<1x8x8xf32>, vector<1x8x8xf32>, vector<1x8x8xf32> -> vector<1x8x8xf32>
    "tpu.trace_stop"() : () -> ()
    %cst_32 = arith.constant dense<0xFF800000> : vector<1x8xf32>
    %97 = vector.multi_reduction <maximumf>, %96, %cst_32 [2] : vector<1x8x8xf32> to vector<1x8xf32>
    %98 = vector.shape_cast %97 : vector<1x8xf32> to vector<1x8x1xf32>
    %99 = vector.broadcast %98 : vector<1x8x1xf32> to vector<1x8x8xf32>
    %100 = arith.subf %96, %99 : vector<1x8x8xf32>
    %101 = math.exp %100 : vector<1x8x8xf32>
    %cst_33 = arith.constant dense<0.000000e+00> : vector<1x8xf32>
    %102 = vector.multi_reduction <add>, %101, %cst_33 [2] : vector<1x8x8xf32> to vector<1x8xf32>
    %103 = vector.shape_cast %102 : vector<1x8xf32> to vector<1x8x1xf32>
    %104 = vector.broadcast %103 : vector<1x8x1xf32> to vector<1x8x8xf32>
    %105 = arith.divf %101, %104 : vector<1x8x8xf32>
    "tpu.trace_start"() <{level = 10 : i32, message = "bqk,bkd->bqd"}> : () -> ()
    %cst_34 = arith.constant dense<0.000000e+00> : vector<1x8x8xf32>
    %106 = tpu.matmul %105, %95, %cst_34 {dimension_numbers = #tpu.dot_dimension_numbers<[2], [1], [1], [2], [0, 0, 0, 1, 1, 2], [0], [0]>} : vector<1x8x8xf32>, vector<1x8x8xf32>, vector<1x8x8xf32> -> vector<1x8x8xf32>
    "tpu.trace_stop"() : () -> ()
    %107 = tpu.concatenate %58, %74, %90, %106 in 2 : vector<1x8x8xf32>, vector<1x8x8xf32>, vector<1x8x8xf32>, vector<1x8x8xf32> -> vector<1x8x32xf32>
    %108 = vector.shape_cast %107 : vector<1x8x32xf32> to vector<8x32xf32>
    %c0_35 = arith.constant 0 : index
    %c0_36 = arith.constant 0 : index
    %109 = vector.load %arg6[%c0_35, %c0_36] : memref<32x32xf32, #tpu.memory_space<vmem>>, vector<32x32xf32>
    %cst_37 = arith.constant dense<0.000000e+00> : vector<8x32xf32>
    %110 = tpu.matmul %108, %109, %cst_37 {dimension_numbers = #tpu.dot_dimension_numbers<[1], [0], [0], [1], [0, 0, 1, 1], [], []>} : vector<8x32xf32>, vector<32x32xf32>, vector<8x32xf32> -> vector<8x32xf32>
    %c0_38 = arith.constant 0 : index
    %c0_39 = arith.constant 0 : index
    %111 = vector.load %arg7[%c0_38, %c0_39] : memref<1x32xf32, #tpu.memory_space<vmem>>, vector<1x32xf32>
    %112 = vector.shape_cast %111 : vector<1x32xf32> to vector<32xf32>
    %113 = vector.shape_cast %112 : vector<32xf32> to vector<1x32xf32>
    %114 = vector.broadcast %113 : vector<1x32xf32> to vector<8x32xf32>
    %115 = arith.addf %110, %114 : vector<8x32xf32>
    %116 = arith.addf %1, %115 : vector<8x32xf32>
    %c0_40 = arith.constant 0 : index
    %c0_41 = arith.constant 0 : index
    %117 = vector.load %arg8[%c0_40, %c0_41] : memref<1x32xf32, #tpu.memory_space<vmem>>, vector<1x32xf32>
    %118 = vector.shape_cast %117 : vector<1x32xf32> to vector<32xf32>
    %c0_42 = arith.constant 0 : index
    %c0_43 = arith.constant 0 : index
    %119 = vector.load %arg9[%c0_42, %c0_43] : memref<1x32xf32, #tpu.memory_space<vmem>>, vector<1x32xf32>
    %120 = vector.shape_cast %119 : vector<1x32xf32> to vector<32xf32>
    %cst_44 = arith.constant dense<0.000000e+00> : vector<8xf32>
    %121 = vector.multi_reduction <add>, %116, %cst_44 [1] : vector<8x32xf32> to vector<8xf32>
    %122 = vector.shape_cast %121 : vector<8xf32> to vector<8x1xf32>
    %cst_45 = arith.constant 3.200000e+01 : f32
    %123 = vector.broadcast %cst_45 : f32 to vector<8x1xf32>
    %124 = arith.divf %122, %123 : vector<8x1xf32>
    %125 = vector.broadcast %124 : vector<8x1xf32> to vector<8x32xf32>
    %126 = arith.subf %116, %125 : vector<8x32xf32>
    %127 = arith.mulf %126, %126 : vector<8x32xf32>
    %cst_46 = arith.constant dense<0.000000e+00> : vector<8xf32>
    %128 = vector.multi_reduction <add>, %127, %cst_46 [1] : vector<8x32xf32> to vector<8xf32>
    %129 = vector.shape_cast %128 : vector<8xf32> to vector<8x1xf32>
    %cst_47 = arith.constant 3.200000e+01 : f32
    %130 = vector.broadcast %cst_47 : f32 to vector<8x1xf32>
    %131 = arith.divf %129, %130 : vector<8x1xf32>
    %132 = vector.broadcast %124 : vector<8x1xf32> to vector<8x32xf32>
    %133 = arith.subf %116, %132 : vector<8x32xf32>
    %cst_48 = arith.constant 1.000000e-07 : f32
    %134 = vector.broadcast %cst_48 : f32 to vector<8x1xf32>
    %135 = arith.addf %131, %134 : vector<8x1xf32>
    %136 = math.rsqrt %135 : vector<8x1xf32>
    %137 = vector.broadcast %136 : vector<8x1xf32> to vector<8x32xf32>
    %138 = arith.mulf %133, %137 : vector<8x32xf32>
    %139 = vector.shape_cast %118 : vector<32xf32> to vector<1x32xf32>
    %140 = vector.broadcast %139 : vector<1x32xf32> to vector<8x32xf32>
    %141 = arith.mulf %138, %140 : vector<8x32xf32>
    %142 = vector.shape_cast %120 : vector<32xf32> to vector<1x32xf32>
    %143 = vector.broadcast %142 : vector<1x32xf32> to vector<8x32xf32>
    %144 = arith.addf %141, %143 : vector<8x32xf32>
    %c0_49 = arith.constant 0 : index
    %c0_50 = arith.constant 0 : index
    %145 = vector.load %arg10[%c0_49, %c0_50] : memref<32x128xf32, #tpu.memory_space<vmem>>, vector<32x128xf32>
    %cst_51 = arith.constant dense<0.000000e+00> : vector<8x128xf32>
    %146 = tpu.matmul %144, %145, %cst_51 {dimension_numbers = #tpu.dot_dimension_numbers<[1], [0], [0], [1], [0, 0, 1, 1], [], []>} : vector<8x32xf32>, vector<32x128xf32>, vector<8x128xf32> -> vector<8x128xf32>
    %c0_52 = arith.constant 0 : index
    %c0_53 = arith.constant 0 : index
    %147 = vector.load %arg11[%c0_52, %c0_53] : memref<1x128xf32, #tpu.memory_space<vmem>>, vector<1x128xf32>
    %148 = vector.shape_cast %147 : vector<1x128xf32> to vector<128xf32>
    %149 = vector.shape_cast %148 : vector<128xf32> to vector<1x128xf32>
    %150 = vector.broadcast %149 : vector<1x128xf32> to vector<8x128xf32>
    %151 = arith.addf %146, %150 : vector<8x128xf32>
    %cst_54 = arith.constant 1.702000e+00 : f32
    %152 = vector.broadcast %cst_54 : f32 to vector<8x128xf32>
    %153 = arith.mulf %152, %151 : vector<8x128xf32>
    %154 = arith.negf %153 : vector<8x128xf32>
    %155 = math.exp %154 : vector<8x128xf32>
    %cst_55 = arith.constant 1.000000e+00 : f32
    %156 = vector.broadcast %cst_55 : f32 to vector<8x128xf32>
    %157 = arith.addf %156, %155 : vector<8x128xf32>
    %158 = arith.divf %156, %157 : vector<8x128xf32>
    %159 = arith.mulf %151, %158 : vector<8x128xf32>
    %c0_56 = arith.constant 0 : index
    %c0_57 = arith.constant 0 : index
    %160 = vector.load %arg12[%c0_56, %c0_57] : memref<128x32xf32, #tpu.memory_space<vmem>>, vector<128x32xf32>
    %cst_58 = arith.constant dense<0.000000e+00> : vector<8x32xf32>
    %161 = tpu.matmul %159, %160, %cst_58 {dimension_numbers = #tpu.dot_dimension_numbers<[1], [0], [0], [1], [0, 0, 1, 1], [], []>} : vector<8x128xf32>, vector<128x32xf32>, vector<8x32xf32> -> vector<8x32xf32>
    %c0_59 = arith.constant 0 : index
    %c0_60 = arith.constant 0 : index
    %162 = vector.load %arg13[%c0_59, %c0_60] : memref<1x32xf32, #tpu.memory_space<vmem>>, vector<1x32xf32>
    %163 = vector.shape_cast %162 : vector<1x32xf32> to vector<32xf32>
    %164 = vector.shape_cast %163 : vector<32xf32> to vector<1x32xf32>
    %165 = vector.broadcast %164 : vector<1x32xf32> to vector<8x32xf32>
    %166 = arith.addf %161, %165 : vector<8x32xf32>
    %167 = arith.addf %116, %166 : vector<8x32xf32>
    %168 = vector.shape_cast %167 : vector<8x32xf32> to vector<1x8x32xf32>
    %c0_61 = arith.constant 0 : index
    %c0_62 = arith.constant 0 : index
    %c0_63 = arith.constant 0 : index
    %169 = vector.load %arg14[%c0_61, %c0_62, %c0_63] : memref<1x8x32xf32, #tpu.memory_space<vmem>>, vector<1x8x32xf32>
    tpu.vector_store %arg14[%c0_61, %c0_62, %c0_63], %168 {strides = array<i32>} : memref<1x8x32xf32, #tpu.memory_space<vmem>>, vector<1x8x32xf32>,
    return
  }
  func.func @transform_0(%arg0: i32) -> (i32, i32, i32) {
    %c0_i32 = arith.constant 0 : i32
    %c0_i32_0 = arith.constant 0 : i32
    %c0_i32_1 = arith.constant 0 : i32
    return %arg0, %c0_i32, %c0_i32_0 : i32, i32, i32
  }
  func.func @transform_1(%arg0: i32) -> (i32, i32) {
    %c0_i32 = arith.constant 0 : i32
    %c0_i32_0 = arith.constant 0 : i32
    %c0_i32_1 = arith.constant 0 : i32
    return %c0_i32, %c0_i32_0 : i32, i32
  }
  func.func @transform_2(%arg0: i32) -> (i32, i32) {
    %c0_i32 = arith.constant 0 : i32
    %c0_i32_0 = arith.constant 0 : i32
    %c0_i32_1 = arith.constant 0 : i32
    return %c0_i32, %c0_i32_0 : i32, i32
  }
  func.func @transform_3(%arg0: i32) -> (i32, i32) {
    %c0_i32 = arith.constant 0 : i32
    %c0_i32_0 = arith.constant 0 : i32
    %c0_i32_1 = arith.constant 0 : i32
    return %c0_i32, %c0_i32_0 : i32, i32
  }
  func.func @transform_4(%arg0: i32) -> (i32, i32) {
    %c0_i32 = arith.constant 0 : i32
    %c0_i32_0 = arith.constant 0 : i32
    %c0_i32_1 = arith.constant 0 : i32
    return %c0_i32, %c0_i32_0 : i32, i32
  }
  func.func @transform_5(%arg0: i32) -> (i32, i32) {
    %c0_i32 = arith.constant 0 : i32
    %c0_i32_0 = arith.constant 0 : i32
    %c0_i32_1 = arith.constant 0 : i32
    return %c0_i32, %c0_i32_0 : i32, i32
  }
  func.func @transform_6(%arg0: i32) -> (i32, i32) {
    %c0_i32 = arith.constant 0 : i32
    %c0_i32_0 = arith.constant 0 : i32
    %c0_i32_1 = arith.constant 0 : i32
    return %c0_i32, %c0_i32_0 : i32, i32
  }
  func.func @transform_7(%arg0: i32) -> (i32, i32) {
    %c0_i32 = arith.constant 0 : i32
    %c0_i32_0 = arith.constant 0 : i32
    %c0_i32_1 = arith.constant 0 : i32
    return %c0_i32, %c0_i32_0 : i32, i32
  }
  func.func @transform_8(%arg0: i32) -> (i32, i32) {
    %c0_i32 = arith.constant 0 : i32
    %c0_i32_0 = arith.constant 0 : i32
    %c0_i32_1 = arith.constant 0 : i32
    return %c0_i32, %c0_i32_0 : i32, i32
  }
  func.func @transform_9(%arg0: i32) -> (i32, i32) {
    %c0_i32 = arith.constant 0 : i32
    %c0_i32_0 = arith.constant 0 : i32
    %c0_i32_1 = arith.constant 0 : i32
    return %c0_i32, %c0_i32_0 : i32, i32
  }
  func.func @transform_10(%arg0: i32) -> (i32, i32) {
    %c0_i32 = arith.constant 0 : i32
    %c0_i32_0 = arith.constant 0 : i32
    %c0_i32_1 = arith.constant 0 : i32
    return %c0_i32, %c0_i32_0 : i32, i32
  }
  func.func @transform_11(%arg0: i32) -> (i32, i32) {
    %c0_i32 = arith.constant 0 : i32
    %c0_i32_0 = arith.constant 0 : i32
    %c0_i32_1 = arith.constant 0 : i32
    return %c0_i32, %c0_i32_0 : i32, i32
  }
  func.func @transform_12(%arg0: i32) -> (i32, i32) {
    %c0_i32 = arith.constant 0 : i32
    %c0_i32_0 = arith.constant 0 : i32
    %c0_i32_1 = arith.constant 0 : i32
    return %c0_i32, %c0_i32_0 : i32, i32
  }
  func.func @transform_13(%arg0: i32) -> (i32, i32, i32) {
    %c0_i32 = arith.constant 0 : i32
    %c0_i32_0 = arith.constant 0 : i32
    %c0_i32_1 = arith.constant 0 : i32
    return %arg0, %c0_i32, %c0_i32_0 : i32, i32, i32
  }
}

</mosaic_0001>

<bundles_post_ra>
// kernel: tpu_custom_call.1
= control target key start
LH: loop header
LB: loop body
LE: loop exit
PB: predicated region body
PF: predicated region fallthrough
CT: control target
= control target key end

     0   :  { %s1602_s0 = inlined_call_operand.vmem [shape: f32[2,8,32], index: 0, kind: input, shape index: {}]   ;;  %s1603_s1 = inlined_call_operand.vmem [shape: f32[1,32], index: 1, kind: input, shape index: {}]   ;;  %s1604_s2 = inlined_call_operand.vmem [shape: f32[1,32], index: 2, kind: input, shape index: {}]   ;;  %s1605_s3 = inlined_call_operand.vmem [shape: f32[32,96], index: 3, kind: input, shape index: {}]   ;;  %s1606_s4 = inlined_call_operand.vmem [shape: f32[1,96], index: 4, kind: input, shape index: {}]   ;;  %s1607_s5 = inlined_call_operand.vmem [shape: f32[32,32], index: 5, kind: input, shape index: {}]   ;;  %s1608_s6 = inlined_call_operand.vmem [shape: f32[1,32], index: 6, kind: input, shape index: {}]   ;;  %s1609_s7 = inlined_call_operand.vmem [shape: f32[1,32], index: 7, kind: input, shape index: {}]   ;;  %s1610_s8 = inlined_call_operand.vmem [shape: f32[1,32], index: 8, kind: input, shape index: {}]   ;;  %s1611_s9 = inlined_call_operand.vmem [shape: f32[32,128], index: 9, kind: input, shape index: {}]   ;;  %s1612_s10 = inlined_call_operand.vmem [shape: f32[1,128], index: 10, kind: input, shape index: {}]   ;;  %s1613_s11 = inlined_call_operand.vmem [shape: f32[128,32], index: 11, kind: input, shape index: {}]   ;;  %s1614_s12 = inlined_call_operand.vmem [shape: f32[1,32], index: 12, kind: input, shape index: {}]   ;;  %s1615_s13 = inlined_call_operand.hbm [shape: f32[2,8,32], index: 13, kind: output, shape index: {}]  }
   0x1   :  { %1616 = sst [smem:[#allocation5_spill]] %s1602_s0 }
   0x2   :  { %1617 = sst [smem:[#allocation6_spill]] %s1603_s1 }
   0x3   :  { %1618 = sst [smem:[#allocation7_spill]] %s1604_s2 }
   0x4   :  { %1619 = sst [smem:[#allocation8_spill]] %s1605_s3 }
   0x5   :  { %18 = vsyncpa [#allocation3], 0 }
   0x6   :  { %20 = vsyncpa [#allocation3 + $0x1], 0  ;;  %s1335_s25 = smov 0   ;;  %s1337_s26 = smov 0  }
   0x7   :  { %s1339_s27 = smov 0   ;;  %s1341_s28 = smov 0  }
   0x8 LB: > { %s1356_s29 = sadd.s32 4294967295, %s1248_s28   ;;  %s1072_s30 = sadd.s32 4294967294, %s1248_s28   ;;  %s1248_s28 = sphi %s1341_s28, %s1631_s28   ;;  %s1244_s27 = sphi %s1339_s27, %s1630_s27   ;;  %s1240_s26 = sphi %s1337_s26, %s1629_s26   ;;  %s1236_s25 = sphi %s1335_s25, %s1628_s25  }
   0x9   : > { %s1360_s14 = sadd.s32 1, %s1248_s28   ;;  %s311_s15 = sadd.s32 1, %s1244_s27 }
   0xa   : > { %s308_s16 = ssub.s32 %s1248_s28, %s1360_s14  ;;  %p321_p0 = scmp.ne.s32.totalorder %s1244_s27, %s1240_s26 }
   0xb   : > { %p309_p1 = scmp.eq.s32.totalorder %s308_s16, 0  ;;  %p322_p2 = scmp.eq.s32.totalorder %s1356_s29, 1 }
   0xc   : > { %p327_p3 = scmp.ne.s32.totalorder %s1240_s26, %s1236_s25  ;;  %p328_p4 = scmp.eq.s32.totalorder %s1072_s30, 1 }
   0xd   : > { %s1371_s17 = scalar_select %p309_p1, %s1244_s27, %s311_s15  }
   0xe   : > { %p1373_p5 = por %p322_p2, %p321_p0  ;;  %p1377_p6 = por %p328_p4, %p327_p3 }
   0xf   : > { %p1075_p7 = scmp.ge.s32.totalorder %s1248_s28, 1  ;;  %p389_p8 = scmp.lt.s32.totalorder %s1248_s28, 3 }
  0x11   : > { %p390_p9 = pnand %p1075_p7, %p389_p8 }
  0x12   : > { %p432_p10 = scmp.lt.s32.totalorder (!%p390_p9), %s1356_s29, 1  ;;  %s1622_s0 = sld [smem:[#allocation5_spill]] (!%p390_p9) }
  0x13   : > { %393 = sbr.rel (%p390_p9) target bundleno = 1908 (0x774), region = 72  ;;  %s1623_s3 = sld [smem:[#allocation8_spill]] (!%p390_p9) }
  0x14   : > { %s1624_s1 = sld [smem:[#allocation6_spill]] (!%p390_p9)  ;;  %s1251_s23 = smov (!%p390_p9), 96  }
  0x15   : > { %s1625_s2 = sld [smem:[#allocation7_spill]] (!%p390_p9)  ;;  %s1253_s30 = smov (!%p390_p9), 120  }
  0x16   : > { %s1254_s15 = smov (!%p390_p9), 88   ;;  %s1255_s16 = smov (!%p390_p9), 80  }
  0x17   : > { %s1258_s22 = smov (!%p390_p9), 64  }
  0x18   : > { %s433_s20 = scalar_select %p432_p10, %s1356_s29, 1  ;;  %vm439_vm0 = vcmask 261120   ;;  %v1250_v2 = vmov 32.0   ;;  %v1154_v33 = vld [vmem:[%s1606_s4] ss:$0 sm:$0xff]  ;;  %vm512_vm5 = vcmask 64512  }
  0x19   : > { %1160 = vrcp.f32 %v1250_v2  ;;  %v480_v14 = vld [vmem:[%s1623_s3 + $0x18] sm:$0xff]  ;;  %v479_v15 = vld [vmem:[%s1623_s3 + $0x10] sm:$0xff]  ;;  %v478_v16 = vld [vmem:[%s1623_s3 + $0x8] sm:$0xff] }
  0x1a   : > { %s1077_s21 = sshll.u32 %s433_s20, 3  ;;  %500 = vmatpush.msra.mxu2 %v480_v14  ;;  %v477_v17 = vld [vmem:[%s1623_s3] sm:$0xff]  ;;  %s1256_s20 = smov 72  }
  0x1b   : > { %s435_s24 = scalar_lea.vmem %s1622_s0, %s1077_s21  ;;  %v1152_v27 = vld [vmem:[%s1624_s1] ss:$0 sm:$0xff]  ;;  %s1257_s21 = smov 104  }
  0x1c   : > { %v1388_v0 = vld [vmem:[%s435_s24] sm:$0xff]  ;;  %501 = vmatpush.msra.mxu2 %v479_v15  ;;  %s1252_s24 = smov 112   ;;  %s1095_s0 = sshll.u32 %s1356_s29, 3 }
  0x1d   : > { %v440_v1 = vsel %vm439_vm0, %v1388_v0, 0.0  ;;  %v1153_v30 = vld [vmem:[%s1625_s2] ss:$0 sm:$0xff] }
  0x1e   : > { %441 = vadd.xlane.f32.xlu0 %v440_v1  ;;  %502 = vmatpush.msra.mxu2 %v478_v16 }
  0x1f   : > { %v1161_v3 = vpop.eup %1160 }
  0x20   : > { %v444_v4 = vmul.f32 32.0, %v1161_v3  ;;  %vm448_vm1 = vweird.f32 %v1161_v3  ;;  %503 = vmatpush.msra.mxu2 %v477_v17 }
  0x22   : > { %v445_v5 = vsub.f32 1.0, %v444_v4 }
  0x24   : > { %v446_v6 = vmul.f32 %v1161_v3, %v445_v5 }
  0x26   : > { %v447_v7 = vadd.f32 %v1161_v3, %v446_v6 }
  0x28   : > { %v1392_v8 = vsel %vm448_vm1, %v1161_v3, %v447_v7 }
  0x91   : > { %v442_v9 = vpop.xlane.xlu0 %441 }
  0x92   : > { %v450_v10 = vmul.f32 %v1392_v8, %v442_v9 }
  0x94   : > { %v451_v11 = vsub.f32 %v1388_v0, %v450_v10 }
  0x96   : > { %v452_v12 = vmul.f32 %v451_v11, %v451_v11 }
  0x98   : > { %v453_v13 = vsel %vm439_vm0, %v452_v12, 0.0 }
  0x99   : > { %454 = vadd.xlane.f32.xlu0 %v453_v13 }
 0x10c   : > { %v455_v18 = vpop.xlane.xlu0 %454 }
 0x10d   : > { %v456_v19 = vmul.f32 %v455_v18, %v1392_v8 }
 0x10f   : > { %v457_v20 = vadd.f32 1e-07, %v456_v19 }
 0x111   : > { %1162 = vrsqrt.f32 %v457_v20  ;;  %vm464_vm3 = vweird.f32 %v457_v20 }
 0x117   : > { %v1163_v21 = vpop.eup %1162 }
 0x118   : > { %v459_v22 = vmul.f32 %v1163_v21, %v457_v20  ;;  %vm465_vm2 = vweird.f32 %v1163_v21 }
 0x119   : > { %vm466_vm4 = vmor %vm464_vm3, %vm465_vm2 }
 0x11a   : > { %v460_v23 = vmul.f32 %v1163_v21, %v459_v22 }
 0x11c   : > { %v461_v24 = vmul.f32 0.5, %v460_v23 }
 0x11e   : > { %v462_v25 = vsub.f32 1.5, %v461_v24 }
 0x120   : > { %v463_v26 = vmul.f32 %v1163_v21, %v462_v25 }
 0x122   : > { %v467_v28 = vsel %vm466_vm4, %v1163_v21, %v463_v26 }
 0x123   : > { %v468_v29 = vmul.f32 %v467_v28, %v451_v11 }
 0x125   : > { %v472_v31 = vmul.f32 %v1152_v27, %v468_v29 }
 0x127   : > { %v476_v32 = vadd.f32 %v1153_v30, %v472_v31 }
 0x129   : > { %1078 = vmatmul.msk.f32.vlgmr.msra.gmra.mxu2 %vm439_vm0, %v476_v32 }
 0x1ac   : > { %v505_v34 = vpop.f32.mrf.mxu2 }
 0x1ad   : > { %v1420_v35 = vadd.f32 %v1154_v33, %v505_v34 }
 0x1af   : > { %510 = vrot.lane.b32.xlu1 %v1420_v35, %s1251_s23  ;;  %v508_v36 = vmul.f32 0.35355338, %v1420_v35  ;;  %s1259_s23 = smov 56  }
 0x1b1   : > { %666 = vrot.lane.b32.xlu0 %v508_v36, %s1252_s24  ;;  %588 = vrot.lane.b32.xlu2 %v508_v36, %s1253_s30  ;;  %s1260_s24 = smov 40   ;;  %s1261_s30 = smov 48  }
 0x1b7   : > { %590 = vrot.lane.b32.xlu1 %v1420_v35, %s1254_s15  ;;  %s1262_s15 = smov 8  }
 0x1b9   : > { %668 = vrot.lane.b32.xlu2 %v1420_v35, %s1255_s16  ;;  %s1263_s16 = smov 24  }
 0x1bf   : > { %746 = vrot.lane.b32.xlu1 %v1420_v35, %s1256_s20  ;;  %s1264_s20 = smov 16  }
 0x1c1   : > { %744 = vrot.lane.b32.xlu2 %v508_v36, %s1257_s21 }
 0x20b   : > { %v589_v37 = vpop.permute.xlu2 %588 }
 0x213   : > { %v669_v39 = vpop.permute.xlu2 %668 }
 0x21b   : > { %v745_v43 = vpop.permute.xlu2 %744 }
 0x221   : > { %v511_v38 = vpop.permute.xlu1 %510 }
 0x222   : > { %1079 = vmatpush.xpose.msk.msra.mxu1 %vm512_vm5, %v511_v38 }
 0x223   : > { %v667_v41 = vpop.permute.xlu0 %666 }
 0x225   : > { %1080 = vmatmul.msk.f32.vlgmr.msra.gmra.mxu1 %vm512_vm5, %v508_v36 }
 0x226   : > { %1085 = vmatpush.xpose.msk.msrb.mxu1 %vm512_vm5, %v669_v39 }
 0x229   : > { %v591_v40 = vpop.permute.xlu1 %590 }
 0x22a   : > { %1082 = vmatpush.xpose.msk.msra.mxu3 %vm512_vm5, %v591_v40 }
 0x22d   : > { %1083 = vmatmul.msk.f32.vlgmr.msra.gmra.mxu3 %vm512_vm5, %v589_v37  ;;  %1086 = vmatmul.msk.f32.vlgmr.msrb.gmra.mxu1 %vm512_vm5, %v667_v41 }
 0x231   : > { %v747_v42 = vpop.permute.xlu1 %746 }
 0x232   : > { %1088 = vmatpush.xpose.msk.msra.mxu1 %vm512_vm5, %v747_v42 }
 0x235   : > { %1089 = vmatmul.msk.f32.vlgmr.msra.gmra.mxu1 %vm512_vm5, %v745_v43 }
 0x2a2   : > { %v535_v44 = vpop.f32.mrf.mxu1 }
 0x2a3   : > { %v538_v45 = vsel %vm512_vm5, %v535_v44, -inf }
 0x2a4   : > { %539 = vmax.xlane.f32.xlu1 %v538_v45 }
 0x2aa   : > { %v691_v46 = vpop.f32.mrf.mxu1 }
 0x2ab   : > { %v694_v47 = vsel %vm512_vm5, %v691_v46, -inf }
 0x2ac   : > { %695 = vmax.xlane.f32.xlu0 %v694_v47 }
 0x2b0   : > { %v613_v48 = vpop.f32.mrf.mxu3 }
 0x2b1   : > { %v616_v49 = vsel %vm512_vm5, %v613_v48, -inf }
 0x2b2   : > { %617 = vmax.xlane.f32.xlu2 %v616_v49  ;;  %v769_v50 = vpop.f32.mrf.mxu1  ;;  %v963_v49 = vld [vmem:[%s1613_s11 + $0x40] sm:$0xff] }
 0x2b3   : > { %v772_v51 = vsel %vm512_vm5, %v769_v50, -inf }
 0x2ba   : > { %773 = vmax.xlane.f32.xlu2 %v772_v51 }
 0x2d2   : > { %562 = vrot.lane.b32.xlu2 %v1420_v35, %s1258_s22  ;;  %s1008_s22 = scalar_lea.hbm %s1615_s13, %s1095_s0 }
 0x2d3   : > { %s1012_s2 = sshll.u32 %s1008_s22, 4  ;;  %s1013_s2 = int_to_ptr.hbm [resolvable:$true] %s1012_s2 }
 0x2d4   : > { %s1200_s3 = sshra.s32 %s1013_s2, 4  ;;  %s1201_s3 = int_to_ptr.hbm [resolvable:$true] %s1200_s3 }
 0x2d5   : > { %p1207_p0 = scmp.lt.s32.totalorder %s1201_s3, %s1615_s13 }
 0x317   : > { %v540_v52 = vpop.xlane.xlu1 %539 }
 0x318   : > { %v541_v53 = vsub.f32 %v535_v44, %v540_v52 }
 0x31a   : > { %v542_v54 = vmul.f32 1.442695, %v541_v53 }
 0x31c   : > { %1164 = vpow2.f32 %v542_v54 }
 0x31f   : > { %v696_v55 = vpop.xlane.xlu0 %695 }
 0x320   : > { %v697_v56 = vsub.f32 %v691_v46, %v696_v55 }
 0x322   : > { %v1165_v57 = vpop.eup %1164  ;;  %v698_v58 = vmul.f32 1.442695, %v697_v56 }
 0x323   : > { %v544_v59 = vsel %vm512_vm5, %v1165_v57, 0.0 }
 0x324   : > { %1166 = vpow2.f32 %v698_v58  ;;  %545 = vadd.xlane.f32.xlu1 %v544_v59 }
 0x325   : > { %v618_v60 = vpop.xlane.xlu2 %617 }
 0x326   : > { %v619_v61 = vsub.f32 %v613_v48, %v618_v60 }
 0x328   : > { %v620_v62 = vmul.f32 1.442695, %v619_v61 }
 0x32a   : > { %v1441_v63 = vpop.eup %1166  ;;  %1168 = vpow2.f32 %v620_v62 }
 0x32b   : > { %v700_v1 = vsel %vm512_vm5, %v1441_v63, 0.0 }
 0x32c   : > { %701 = vadd.xlane.f32.xlu1 %v700_v1 }
 0x32d   : > { %v774_v2 = vpop.xlane.xlu2 %773 }
 0x32e   : > { %v775_v3 = vsub.f32 %v769_v50, %v774_v2 }
 0x330   : > { %v1445_v4 = vpop.eup %1168  ;;  %v776_v5 = vmul.f32 1.442695, %v775_v3 }
 0x331   : > { %v622_v6 = vsel %vm512_vm5, %v1445_v4, 0.0 }
 0x332   : > { %1170 = vpow2.f32 %v776_v5  ;;  %623 = vadd.xlane.f32.xlu2 %v622_v6  ;;  %v842_v5 = vld [vmem:[%s1607_s5 + $0x18] sm:$0xff]  ;;  %v840_v6 = vld [vmem:[%s1607_s5 + $0x8] sm:$0xff] }
 0x333   : > { %862 = vmatpush.msrb.mxu1 %v842_v5 }
 0x335   : > { %v563_v7 = vpop.permute.xlu2 %562 }
 0x336   : > { %583 = vmatpush.msrb.mxu2 %v563_v7  ;;  %v839_v7 = vld [vmem:[%s1607_s5] sm:$0xff] }
 0x338   : > { %v1449_v9 = vpop.eup %1170 }
 0x339   : > { %v778_v10 = vsel %vm512_vm5, %v1449_v9, 0.0 }
 0x33a   : > { %779 = vadd.xlane.f32.xlu0 %v778_v10 }
 0x345   : > { %640 = vrot.lane.b32.xlu1 %v1420_v35, %s1259_s23 }
 0x34a   : > { %796 = vrot.lane.b32.xlu2 %v1420_v35, %s1260_s24 }
 0x34e   : > { %718 = vrot.lane.b32.xlu0 %v1420_v35, %s1261_s30  ;;  %s429_s30 = sand.u32 1, %s1240_s26  }
 0x34f   : > { %s998_s29 = scalar_lea.sflag [#allocation3], %s429_s30 }
 0x397   : > { %v546_v11 = vpop.xlane.xlu1 %545 }
 0x398   : > { %1172 = vrcp.f32 %v546_v11  ;;  %v558_v16 = vand.u32 2147483648, %v546_v11  ;;  %v556_v18 = vand.u32 2147483647, %v546_v11  ;;  %vm552_vm7 = vweird.f32 %v546_v11 }
 0x39a   : > { %v559_v21 = vor.u32 1.1754944e-38, %v558_v16  ;;  %vm557_vm9 = vcmp.eq.f32.partialorder %v556_v18, 8.507059e+37 }
 0x39e   : > { %v1173_v12 = vpop.eup %1172 }
 0x39f   : > { %v548_v13 = vmul.f32 %v1173_v12, %v546_v11  ;;  %v702_v14 = vpop.xlane.xlu1 %701  ;;  %vm553_vm6 = vweird.f32 %v1173_v12 }
 0x3a0   : > { %1174 = vrcp.f32 %v702_v14  ;;  %vm554_vm8 = vmor %vm552_vm7, %vm553_vm6  ;;  %v714_v43 = vand.u32 2147483648, %v702_v14  ;;  %vm708_vm15 = vweird.f32 %v702_v14  ;;  %v712_v47 = vand.u32 2147483647, %v702_v14 }
 0x3a1   : > { %v549_v15 = vsub.f32 1.0, %v548_v13 }
 0x3a2   : > { %v715_v54 = vor.u32 1.1754944e-38, %v714_v43  ;;  %vm713_vm4 = vcmp.eq.f32.partialorder %v712_v47, 8.507059e+37  ;;  %v969_v43 = vld [vmem:[%s1613_s11 + $0x70] sm:$0xff] }
 0x3a3   : > { %v550_v17 = vmul.f32 %v1173_v12, %v549_v15  ;;  %v1155_v15 = vld [vmem:[%s1608_s6] ss:$0 sm:$0xff]  ;;  %v965_v47 = vld [vmem:[%s1613_s11 + $0x50] sm:$0xff] }
 0x3a5   : > { %v551_v19 = vadd.f32 %v1173_v12, %v550_v17  ;;  %v624_v20 = vpop.xlane.xlu2 %623 }
 0x3a6   : > { %1176 = vrcp.f32 %v624_v20  ;;  %v1175_v22 = vpop.eup %1174  ;;  %v636_v32 = vand.u32 2147483648, %v624_v20  ;;  %v634_v34 = vand.u32 2147483647, %v624_v20  ;;  %vm630_vm11 = vweird.f32 %v624_v20 }
 0x3a7   : > { %v555_v23 = vsel %vm554_vm8, %v1173_v12, %v551_v19  ;;  %v704_v26 = vmul.f32 %v1175_v22, %v702_v14  ;;  %vm709_vm14 = vweird.f32 %v1175_v22  ;;  %vm835_vm8 = vcmask 130048  }
 0x3a8   : > { %v560_v24 = vsel %vm557_vm9, %v559_v21, %v555_v23  ;;  %v637_v38 = vor.u32 1.1754944e-38, %v636_v32  ;;  %vm635_vm13 = vcmp.eq.f32.partialorder %v634_v34, 8.507059e+37  ;;  %vm1458_vm1 = vmor %vm708_vm15, %vm709_vm14  ;;  %vm837_vm9 = vcmask 195584  }
 0x3a9   : > { %v561_v25 = vmul.f32 %v1165_v57, %v560_v24  ;;  %v705_v30 = vsub.f32 1.0, %v704_v26  ;;  %v904_v26 = vld [vmem:[%s1611_s9 + $0x8] sm:$0xff] }
 0x3ab   : > { %1081 = vmatmul.msk.f32.vlgmr.msrb.gmra.mxu2 %vm512_vm5, %v561_v25  ;;  %v706_v35 = vmul.f32 %v1175_v22, %v705_v30  ;;  %v906_v25 = vld [vmem:[%s1611_s9 + $0x18] sm:$0xff] }
 0x3ac   : > { %v1177_v27 = vpop.eup %1176 }
 0x3ad   : > { %v626_v28 = vmul.f32 %v1177_v27, %v624_v20  ;;  %v780_v29 = vpop.xlane.xlu0 %779  ;;  %vm631_vm10 = vweird.f32 %v1177_v27  ;;  %v707_v41 = vadd.f32 %v1175_v22, %v706_v35  ;;  %v797_v50 = vpop.permute.xlu2 %796 }
 0x3ae   : > { %1178 = vrcp.f32 %v780_v29  ;;  %vm632_vm12 = vmor %vm630_vm11, %vm631_vm10  ;;  %v792_v48 = vand.u32 2147483648, %v780_v29  ;;  %v790_v52 = vand.u32 2147483647, %v780_v29  ;;  %vm786_vm3 = vweird.f32 %v780_v29 }
 0x3af   : > { %v627_v31 = vsub.f32 1.0, %v626_v28  ;;  %v711_v53 = vsel %vm1458_vm1, %v1175_v22, %v707_v41 }
 0x3b0   : > { %v793_v56 = vor.u32 1.1754944e-38, %v792_v48  ;;  %vm791_vm7 = vcmp.eq.f32.partialorder %v790_v52, 8.507059e+37  ;;  %v716_v58 = vsel %vm713_vm4, %v715_v54, %v711_v53  ;;  %v964_v48 = vld [vmem:[%s1613_s11 + $0x48] sm:$0xff]  ;;  %v959_v53 = vld [vmem:[%s1613_s11 + $0x20] sm:$0xff]  ;;  %v958_v54 = vld [vmem:[%s1613_s11 + $0x18] sm:$0xff] }
 0x3b1   : > { %v628_v33 = vmul.f32 %v1177_v27, %v627_v31  ;;  %v717_v62 = vmul.f32 %v1441_v63, %v716_v58  ;;  %v841_v63 = vld [vmem:[%s1607_s5 + $0x10] sm:$0xff]  ;;  %v960_v52 = vld [vmem:[%s1613_s11 + $0x28] sm:$0xff] }
 0x3b2   : > { %863 = vmatpush.msrb.mxu1 %v841_v63 }
 0x3b3   : > { %v629_v36 = vadd.f32 %v1177_v27, %v628_v33 }
 0x3b4   : > { %v1179_v37 = vpop.eup %1178  ;;  %864 = vmatpush.msrb.mxu1 %v840_v6 }
 0x3b5   : > { %v633_v39 = vsel %vm632_vm12, %v1177_v27, %v629_v36  ;;  %v782_v40 = vmul.f32 %v1179_v37, %v780_v29  ;;  %vm787_vm2 = vweird.f32 %v1179_v37  ;;  %v903_v27 = vld [vmem:[%s1611_s9] sm:$0xff] }
 0x3b6   : > { %v638_v42 = vsel %vm635_vm13, %v637_v38, %v633_v39  ;;  %vm788_vm6 = vmor %vm786_vm3, %vm787_vm2  ;;  %865 = vmatpush.msrb.mxu1 %v839_v7 }
 0x3b7   : > { %v783_v44 = vsub.f32 1.0, %v782_v40  ;;  %v641_v45 = vpop.permute.xlu1 %640  ;;  %v639_v46 = vmul.f32 %v1445_v4, %v638_v42  ;;  %v970_v42 = vld [vmem:[%s1613_s11 + $0x78] sm:$0xff] }
 0x3b8   : > { %661 = vmatpush.msra.mxu2 %v641_v45  ;;  %975 = vmatpush.msra.mxu0 %v970_v42  ;;  %v967_v45 = vld [vmem:[%s1613_s11 + $0x60] sm:$0xff] }
 0x3b9   : > { %v784_v51 = vmul.f32 %v1179_v37, %v783_v44  ;;  %1084 = vmatmul.msk.f32.vlgmr.msra.gmra.mxu2 %vm512_vm5, %v639_v46  ;;  %v968_v44 = vld [vmem:[%s1613_s11 + $0x68] sm:$0xff]  ;;  %v966_v46 = vld [vmem:[%s1613_s11 + $0x58] sm:$0xff] }
 0x3ba   : > { %817 = vmatpush.msrb.mxu2 %v797_v50  ;;  %976 = vmatpush.msra.mxu0 %v969_v43  ;;  %v962_v50 = vld [vmem:[%s1613_s11 + $0x38] sm:$0xff] }
 0x3bb   : > { %v785_v55 = vadd.f32 %v1179_v37, %v784_v51  ;;  %v961_v51 = vld [vmem:[%s1613_s11 + $0x30] sm:$0xff] }
 0x3bc   : > { %977 = vmatpush.msra.mxu0 %v968_v44 }
 0x3bd   : > { %v789_v57 = vsel %vm788_vm6, %v1179_v37, %v785_v55  ;;  %v1156_v37 = vld [vmem:[%s1609_s7] ss:$0 sm:$0xff]  ;;  %v957_v55 = vld [vmem:[%s1613_s11 + $0x10] sm:$0xff] }
 0x3be   : > { %v794_v59 = vsel %vm791_vm7, %v793_v56, %v789_v57  ;;  %978 = vmatpush.msra.mxu0 %v967_v45  ;;  %v1158_v56 = vld [vmem:[%s1612_s10] ss:$0 sm:$0xff]  ;;  %v956_v57 = vld [vmem:[%s1613_s11 + $0x8] sm:$0xff] }
 0x3bf   : > { %v795_v60 = vmul.f32 %v1449_v9, %v794_v59  ;;  %v955_v59 = vld [vmem:[%s1613_s11] sm:$0xff] }
 0x3c0   : > { %v719_v61 = vpop.permute.xlu0 %718  ;;  %979 = vmatpush.msra.mxu0 %v966_v46 }
 0x3c1   : > { %739 = vmatpush.msrb.mxu3 %v719_v61  ;;  %1090 = vmatmul.msk.f32.vlgmr.msrb.gmra.mxu2 %vm512_vm5, %v795_v60 }
 0x3c2   : > { %1087 = vmatmul.msk.f32.vlgmr.msrb.gmra.mxu3 %vm512_vm5, %v717_v62  ;;  %980 = vmatpush.msra.mxu0 %v965_v47 }
 0x3c3   : > { %926 = vmatpush.msra.mxu3 %v906_v25 }
 0x3c4   : > { %981 = vmatpush.msra.mxu0 %v964_v48 }
 0x3c6   : > { %982 = vmatpush.msra.mxu0 %v963_v49 }
 0x3c8   : > { %983 = vmatpush.msra.mxu0 %v962_v50 }
 0x3ca   : > { %984 = vmatpush.msra.mxu0 %v961_v51 }
 0x3cc   : > { %985 = vmatpush.msra.mxu0 %v960_v52 }
 0x3ce   : > { %986 = vmatpush.msra.mxu0 %v959_v53 }
 0x3d0   : > { %987 = vmatpush.msra.mxu0 %v958_v54 }
 0x3d2   : > { %988 = vmatpush.msra.mxu0 %v957_v55 }
 0x3d4   : > { %989 = vmatpush.msra.mxu0 %v956_v57 }
 0x3d6   : > { %990 = vmatpush.msra.mxu0 %v955_v59 }
 0x42e   : > { %v585_v1 = vpop.f32.mrf.mxu2 }
 0x43c   : > { %v663_v2 = vpop.f32.mrf.mxu2 }
 0x43d   : > { %823 = vrot.lane.b32.xlu0 %v663_v2, %s1262_s15  ;;  %s1076_s15 = sshll.u32 %s429_s30, 3 }
 0x43e   : > { %s431_s23 = scalar_lea.vmem [#allocation2], %s1076_s15  ;;  %s1206_s15 = scalar_lea.hbm %s1615_s13, 16 }
 0x43f   : > { %s1010_s24 = sshll.u32 %s431_s23, 4  ;;  %s1011_s24 = int_to_ptr.vmem [resolvable:$true] %s1010_s24 }
 0x444   : > { %v819_v3 = vpop.f32.mrf.mxu2 }
 0x445   : > { %v741_v4 = vpop.f32.mrf.mxu3  ;;  %831 = vrot.lane.b32.xlu2 %v819_v3, %s1263_s16  ;;  %s1202_s16 = scalar_lea.hbm %s1201_s3, 8 }
 0x446   : > { %827 = vrot.lane.b32.xlu1 %v741_v4, %s1264_s20  ;;  %p1203_p11 = scmp.ne.s32.totalorder %s1201_s3, %s1202_s16  ;;  %p1208_p1 = scmp.lt.s32.totalorder %s1206_s15, %s1202_s16 }
 0x448   : > { %p1204_p12 = pnand %p1203_p11, %p1373_p5  ;;  %p1209_p2 = por %p1208_p1, %p1207_p0 }
 0x44a   : > { %p1205_p13 = pneg %p1204_p12 }
 0x44c   : > { %p1210_p3 = pnand %p1209_p2, %p1205_p13 }
 0x49f   : > { %v832_v12 = vpop.permute.xlu2 %831 }
 0x4af   : > { %v824_v9 = vpop.permute.xlu0 %823 }
 0x4b0   : > { %v834_v10 = vsel %vm512_vm5, %v585_v1, %v824_v9 }
 0x4b8   : > { %v828_v11 = vpop.permute.xlu1 %827 }
 0x4b9   : > { %v836_v13 = vsel %vm835_vm8, %v834_v10, %v828_v11 }
 0x4ba   : > { %v838_v14 = vsel %vm837_vm9, %v836_v13, %v832_v12 }
 0x4bb   : > { %1091 = vmatmul.msk.f32.vlgmr.msrb.gmra.mxu1 %vm439_vm0, %v838_v14  ;;  %v1159_v14 = vld [vmem:[%s1614_s12] ss:$0 sm:$0xff] }
 0x538   : > { %v867_v16 = vpop.f32.mrf.mxu1 }
 0x539   : > { %v868_v17 = vadd.f32 %v1155_v15, %v867_v16 }
 0x53b   : > { %v1487_v18 = vadd.f32 %v868_v17, %v1388_v0  ;;  %v905_v0 = vld [vmem:[%s1611_s9 + $0x10] sm:$0xff] }
 0x53c   : > { %927 = vmatpush.msra.mxu3 %v905_v0 }
 0x53d   : > { %v873_v19 = vsel %vm439_vm0, %v1487_v18, 0.0 }
 0x53e   : > { %874 = vadd.xlane.f32.xlu0 %v873_v19  ;;  %928 = vmatpush.msra.mxu3 %v904_v26 }
 0x540   : > { %929 = vmatpush.msra.mxu3 %v903_v27 }
 0x5b1   : > { %v875_v20 = vpop.xlane.xlu0 %874 }
 0x5b2   : > { %v876_v21 = vmul.f32 %v875_v20, %v1392_v8 }
 0x5b4   : > { %v877_v22 = vsub.f32 %v1487_v18, %v876_v21 }
 0x5b6   : > { %v878_v23 = vmul.f32 %v877_v22, %v877_v22 }
 0x5b8   : > { %v879_v24 = vsel %vm439_vm0, %v878_v23, 0.0 }
 0x5b9   : > { %880 = vadd.xlane.f32.xlu1 %v879_v24 }
 0x62c   : > { %v881_v28 = vpop.xlane.xlu1 %880 }
 0x62d   : > { %v882_v29 = vmul.f32 %v881_v28, %v1392_v8  ;;  %v1157_v8 = vld [vmem:[%s1610_s8] ss:$0 sm:$0xff] }
 0x62f   : > { %v883_v30 = vadd.f32 1e-07, %v882_v29 }
 0x631   : > { %1180 = vrsqrt.f32 %v883_v30  ;;  %vm890_vm10 = vweird.f32 %v883_v30 }
 0x637   : > { %v1181_v31 = vpop.eup %1180 }
 0x638   : > { %v885_v32 = vmul.f32 %v1181_v31, %v883_v30  ;;  %vm891_vm5 = vweird.f32 %v1181_v31 }
 0x639   : > { %vm892_vm11 = vmor %vm890_vm10, %vm891_vm5 }
 0x63a   : > { %v886_v33 = vmul.f32 %v1181_v31, %v885_v32 }
 0x63c   : > { %v887_v34 = vmul.f32 0.5, %v886_v33 }
 0x63e   : > { %v888_v35 = vsub.f32 1.5, %v887_v34 }
 0x640   : > { %v889_v36 = vmul.f32 %v1181_v31, %v888_v35 }
 0x642   : > { %v893_v38 = vsel %vm892_vm11, %v1181_v31, %v889_v36 }
 0x643   : > { %v894_v39 = vmul.f32 %v893_v38, %v877_v22 }
 0x645   : > { %v898_v40 = vmul.f32 %v1156_v37, %v894_v39 }
 0x647   : > { %v902_v41 = vadd.f32 %v1157_v8, %v898_v40 }
 0x649   : > { %1092 = vmatmul.msk.f32.vlgmr.msra.gmra.mxu3 %vm439_vm0, %v902_v41 }
 0x6cc   : > { %v931_v58 = vpop.f32.mrf.mxu3 }
 0x6cd   : > { %v932_v60 = vadd.f32 %v1158_v56, %v931_v58 }
 0x6cf   : > { %v1093_v61 = vmul.f32 -1.702, %v932_v60 }
 0x6d1   : > { %v936_v62 = vmul.f32 1.442695, %v1093_v61 }
 0x6d3   : > { %1182 = vpow2.f32 %v936_v62 }
 0x6d9   : > { %v1183_v1 = vpop.eup %1182 }
 0x6da   : > { %v938_v2 = vadd.f32 1.0, %v1183_v1 }
 0x6dc   : > { %1184 = vrcp.f32 %v938_v2  ;;  %v950_v63 = vand.u32 2147483648, %v938_v2  ;;  %v948_v7 = vand.u32 2147483647, %v938_v2  ;;  %vm944_vm13 = vweird.f32 %v938_v2 }
 0x6de   : > { %v951_v10 = vor.u32 1.1754944e-38, %v950_v63  ;;  %vm949_vm15 = vcmp.eq.f32.partialorder %v948_v7, 8.507059e+37 }
 0x6e2   : > { %v1185_v3 = vpop.eup %1184 }
 0x6e3   : > { %v940_v4 = vmul.f32 %v1185_v3, %v938_v2  ;;  %vm945_vm12 = vweird.f32 %v1185_v3 }
 0x6e4   : > { %vm946_vm14 = vmor %vm944_vm13, %vm945_vm12 }
 0x6e5   : > { %v941_v5 = vsub.f32 1.0, %v940_v4 }
 0x6e7   : > { %v942_v6 = vmul.f32 %v1185_v3, %v941_v5 }
 0x6e9   : > { %v943_v9 = vadd.f32 %v1185_v3, %v942_v6 }
 0x6eb   : > { %v947_v11 = vsel %vm946_vm14, %v1185_v3, %v943_v9 }
 0x6ec   : > { %v952_v12 = vsel %vm949_vm15, %v951_v10, %v947_v11 }
 0x6ed   : > { %v954_v13 = vmul.f32 %v952_v12, %v932_v60 }
 0x6ef   : > { %991 = vmatmul.f32.vlgmr.msra.gmra.mxu0 %v954_v13 }
 0x76c   : > { %v992_v15 = vpop.f32.mrf.mxu0 }
 0x76d   : > { %v993_v16 = vadd.f32 %v1159_v14, %v992_v15 }
 0x76f   : > { %v995_v17 = vadd.f32 %v993_v16, %v1487_v18 }
 0x771   : > { %996 = vst.msk [vmem:[%s431_s23] sm:$0xff] %vm439_vm0, %v995_v17 }
 0x772   : > { %1213 = shalt.err (!%p1210_p3)
}
 0x773   : > { %1098 = dma.vmem_to_hbm [thread:$0]  (%p1373_p5), %s1011_s24, 128, %s1013_s2, %s998_s29  }
 0x774 PF: > { %p1104_p4 = scmp.ge.s32.totalorder %s1248_s28, 2  ;;  %s1024_s30 = sand.u32 1, %s1236_s25  }
 0x775   : > { %s1025_s22 = scalar_lea.sflag [#allocation3], %s1024_s30 }
 0x776   : > { %p1101_p7 = pnand %p1104_p4, %p1377_p6 }
 0x778   : > { %p1102_p8 = pneg %p1101_p7 }
 0x77a   : > { %1231 = dma.done.wait (%p1102_p8), %s1025_s22, 128  }
 0x77b   : > { %1233 = vsyncadd (%p1102_p8), %s1025_s22, 4294967168  ;;  %p23_p9 = scmp.ge.s32.totalorder %s1360_s14, 4   ;;  %s1628_s25 = smov %s1240_s26 }
 0x77c   : > { %s1629_s26 = smov %s1244_s27  ;;  %s1630_s27 = smov %s1371_s17 }
 0x77d   : > { %s1631_s28 = smov %s1360_s14  ;;  %25 = sbr.rel (!%p23_p9) target bundleno = 8 (0x8), region = 107 }
 0x782   :  { %1031 = vsyncpa [#allocation3], 1 }
 0x783   :  { %1033 = vsyncpa [#allocation3 + $0x1], 1 }

</bundles_post_ra>
